<compile_context>
chip_gen: v7x
topology: tpu7x:2x2x1
jax: 0.10.0
libtpu: 0.0.40
codegen_flags: <defaults>
</compile_context>

<pallas_src>
import functools

import jax
import jax.numpy as jnp
from jax.experimental import pallas as pl
from jax.experimental.pallas import tpu as pltpu

IN_FEATURES = 784
HIDDEN = 32
OUT_FEATURES = 10


def mlp_kernel(x_ref, w1_ref, b1_ref, w23_ref, b23_ref, o_ref):
    # x arrives as f32 straight from HBM; cast to bf16 on the VPU just before
    # the MXU matmul (f32 accumulation).
    x_bf16 = x_ref[...].astype(jnp.bfloat16)
    h = jnp.dot(x_bf16, w1_ref[...], preferred_element_type=jnp.float32)
    # Bias + ReLU in f32 on the VPU.
    h = jnp.maximum(h + b1_ref[...], 0.0)
    # Fused layer2+layer3: tiny [32, 10] bf16 matmul, f32 accumulation.
    out = jnp.dot(h.astype(jnp.bfloat16), w23_ref[...],
                  preferred_element_type=jnp.float32)
    o_ref[...] = (out + b23_ref[...]).astype(o_ref.dtype)


def _mlp_call(x, w1_c, b1, w23_c, b23, *, rows, tile_rows, num_tiles):
    """One pallas_call covering the first `rows = num_tiles * tile_rows` rows of x."""
    flops = 2 * rows * IN_FEATURES * HIDDEN + 2 * rows * HIDDEN * OUT_FEATURES
    bytes_accessed = (rows * IN_FEATURES * 4          # x (f32, streamed)
                      + rows * OUT_FEATURES * 4       # output
                      + IN_FEATURES * HIDDEN * 2      # W1 (bf16, grid-invariant)
                      + HIDDEN * OUT_FEATURES * 2)    # fused W23
    return pl.pallas_call(
        mlp_kernel,
        out_shape=jax.ShapeDtypeStruct((rows, OUT_FEATURES), jnp.float32),
        grid=(num_tiles,),
        in_specs=[
            pl.BlockSpec((tile_rows, IN_FEATURES), lambda i: (i, 0)),   # x tile (streamed)
            pl.BlockSpec((IN_FEATURES, HIDDEN), lambda i: (0, 0)),      # W1 (resident)
            pl.BlockSpec((1, HIDDEN), lambda i: (0, 0)),                # b1
            pl.BlockSpec((HIDDEN, OUT_FEATURES), lambda i: (0, 0)),     # fused W23
            pl.BlockSpec((1, OUT_FEATURES), lambda i: (0, 0)),          # fused b23
        ],
        out_specs=pl.BlockSpec((tile_rows, OUT_FEATURES), lambda i: (i, 0)),
        compiler_params=pltpu.CompilerParams(
            dimension_semantics=("parallel",),     # shard batch tiles across TCs (v7x)
            vmem_limit_bytes=32 * 1024 * 1024,     # headroom for 2048-row f32 tiles on v5e
        ),
        cost_estimate=pl.CostEstimate(flops=flops, transcendentals=0,
                                      bytes_accessed=bytes_accessed),
    )(x, w1_c, b1, w23_c, b23)


@functools.partial(jax.jit, static_argnames=("tile_b",))
def mlp_forward(x, w1, b1, w2, b2, w3, b3, *, tile_b=None):
    """Forward pass of the 3-layer MLPModel.

    x:  [B, 784] f32
    w*: [in, out] f32 (so y = x @ W + b, identical to PyTorch's x @ W.T)
    b*: [1, out] f32
    """
    B = x.shape[0]

    # Algebraic fusion of layer2 + layer3 (no activation between them in the
    # layerCount=3 config).  Trace-time, tiny operands.
    w23 = (w2 @ w3).astype(jnp.bfloat16)   # [HIDDEN, OUT_FEATURES]
    b23 = b2 @ w3 + b3                     # [1, OUT_FEATURES], stays f32
    w1_c = w1.astype(jnp.bfloat16)         # [IN_FEATURES, HIDDEN], tiny

    if tile_b is None:
        # Aim for ~8 grid tiles (keeps both v7x TCs busy + gives pipeline depth),
        # capped at 2048 rows so double-buffered f32 x tiles fit VMEM everywhere.
        tile_b = max(8, min(2048, ((pl.cdiv(B, 8) + 7) // 8) * 8))
    # Keep the batch tile a multiple of 8 sublanes.
    tile_b = max(8, ((tile_b + 7) // 8) * 8)

    main = (B // tile_b) * tile_b
    rem = B - main

    outs = []
    if main > 0:
        # Reads the first `main` rows directly out of the original x buffer
        # (no pad / copy of the dominant operand).
        outs.append(_mlp_call(x, w1_c, b1, w23, b23,
                              rows=main, tile_rows=tile_b,
                              num_tiles=main // tile_b))
    if rem > 0:
        # Tail rows: one small single-block call; only the tail slice is copied.
        outs.append(_mlp_call(x[main:], w1_c, b1, w23, b23,
                              rows=rem, tile_rows=rem, num_tiles=1))
    return outs[0] if len(outs) == 1 else jnp.concatenate(outs, axis=0)


def init_linear(key, fan_in, fan_out):
    """Deterministic init mimicking PyTorch nn.Linear: U(-1/sqrt(fan_in), 1/sqrt(fan_in))."""
    kw, kb = jax.random.split(key)
    bound = 1.0 / jnp.sqrt(jnp.float32(fan_in))
    w = jax.random.uniform(kw, (fan_in, fan_out), jnp.float32, -bound, bound)
    b = jax.random.uniform(kb, (1, fan_out), jnp.float32, -bound, bound)
    return w, b


def reference_forward(x, w1, b1, w2, b2, w3, b3):
    """Pure-JAX f32 reference with the exact (unfused) module semantics."""
    h = jnp.maximum(x @ w1 + b1, 0.0)
    h = h @ w2 + b2
    return h @ w3 + b3


def reference_forward_same_precision(x, w1, b1, w2, b2, w3, b3):
    """Pure-JAX reference matching the kernel's fusion + mixed precision."""
    w23 = (w2 @ w3).astype(jnp.bfloat16)
    b23 = b2 @ w3 + b3
    h = jnp.dot(x.astype(jnp.bfloat16), w1.astype(jnp.bfloat16),
                preferred_element_type=jnp.float32)
    h = jnp.maximum(h + b1, 0.0)
    return jnp.dot(h.astype(jnp.bfloat16), w23,
                   preferred_element_type=jnp.float32) + b23


if __name__ == "__main__":
    key = jax.random.PRNGKey(0)
    kx, k1, k2, k3, kx2 = jax.random.split(key, 5)

    w1, b1 = init_linear(k1, IN_FEATURES, HIDDEN)
    w2, b2 = init_linear(k2, HIDDEN, HIDDEN)
    w3, b3 = init_linear(k3, HIDDEN, OUT_FEATURES)
    params = (w1, b1, w2, b2, w3, b3)

    # --- small batch, default tile (single grid step, main path only) ---
    B = 8
    x = jax.random.normal(kx, (B, IN_FEATURES), jnp.float32)
    out = jax.block_until_ready(mlp_forward(x, *params))
    assert out.shape == (B, OUT_FEATURES)
    assert jnp.allclose(out, reference_forward(x, *params), atol=2e-2, rtol=2e-2), \
        "drift vs f32 reference"
    assert jnp.allclose(out, reference_forward_same_precision(x, *params),
                        atol=2e-3, rtol=2e-3), "mismatch vs same-precision reference"

    # --- ragged batch, explicit tile (multi-tile main path + tail path) ---
    B2 = 300
    x2 = jax.random.normal(kx2, (B2, IN_FEATURES), jnp.float32)
    out2 = jax.block_until_ready(mlp_forward(x2, *params, tile_b=128))
    assert out2.shape == (B2, OUT_FEATURES)
    assert jnp.allclose(out2, reference_forward(x2, *params), atol=2e-2, rtol=2e-2), \
        "drift vs f32 reference (ragged)"
    assert jnp.allclose(out2, reference_forward_same_precision(x2, *params),
                        atol=2e-3, rtol=2e-3), "mismatch vs same-precision reference (ragged)"

    print("KERNEL_OK")
</pallas_src>

<mosaic_0001>
module attributes {stable_mosaic.version = 11 : i64} {
  func.func @mlp_kernel(%arg0: i32, %arg1: memref<8x784xf32, #tpu.memory_space<vmem>>, %arg2: memref<784x32xbf16, #tpu.memory_space<vmem>>, %arg3: memref<1x32xf32, #tpu.memory_space<vmem>>, %arg4: memref<32x10xbf16, #tpu.memory_space<vmem>>, %arg5: memref<1x10xf32, #tpu.memory_space<vmem>>, %arg6: memref<8x10xf32, #tpu.memory_space<vmem>>) attributes {dimension_semantics = [#tpu.dimension_semantics<parallel>], iteration_bounds = array<i64: 1>, scalar_prefetch = 0 : i64, scratch_operands = 0 : i64, tpu.core_type = #tpu.core_type<tc>, window_params = [{transform_indices = @transform_0, window_bounds = array<i64: 8, 784>}, {pipeline_mode = #tpu.pipeline_mode<synchronous>, transform_indices = @transform_1, window_bounds = array<i64: 784, 32>}, {pipeline_mode = #tpu.pipeline_mode<synchronous>, transform_indices = @transform_2, window_bounds = array<i64: 1, 32>}, {pipeline_mode = #tpu.pipeline_mode<synchronous>, transform_indices = @transform_3, window_bounds = array<i64: 32, 10>}, {pipeline_mode = #tpu.pipeline_mode<synchronous>, transform_indices = @transform_4, window_bounds = array<i64: 1, 10>}, {transform_indices = @transform_5, window_bounds = array<i64: 8, 10>}]} {
    %c0 = arith.constant 0 : index
    %c0_0 = arith.constant 0 : index
    %0 = vector.load %arg1[%c0, %c0_0] : memref<8x784xf32, #tpu.memory_space<vmem>>, vector<8x784xf32>
    %1 = arith.truncf %0 : vector<8x784xf32> to vector<8x784xbf16>
    %c0_1 = arith.constant 0 : index
    %c0_2 = arith.constant 0 : index
    %2 = vector.load %arg2[%c0_1, %c0_2] : memref<784x32xbf16, #tpu.memory_space<vmem>>, vector<784x32xbf16>
    %cst = arith.constant dense<0.000000e+00> : vector<8x32xf32>
    %3 = tpu.matmul %1, %2, %cst {dimension_numbers = #tpu.dot_dimension_numbers<[1], [0], [0], [1], [0, 0, 1, 1], [], []>} : vector<8x784xbf16>, vector<784x32xbf16>, vector<8x32xf32> -> vector<8x32xf32>
    %c0_3 = arith.constant 0 : index
    %c0_4 = arith.constant 0 : index
    %4 = vector.load %arg3[%c0_3, %c0_4] : memref<1x32xf32, #tpu.memory_space<vmem>>, vector<1x32xf32>
    %5 = vector.broadcast %4 : vector<1x32xf32> to vector<8x32xf32>
    %6 = arith.addf %3, %5 : vector<8x32xf32>
    %cst_5 = arith.constant 0.000000e+00 : f32
    %7 = vector.broadcast %cst_5 : f32 to vector<8x32xf32>
    %8 = arith.maximumf %6, %7 : vector<8x32xf32>
    %9 = arith.truncf %8 : vector<8x32xf32> to vector<8x32xbf16>
    %c0_6 = arith.constant 0 : index
    %c0_7 = arith.constant 0 : index
    %10 = vector.load %arg4[%c0_6, %c0_7] : memref<32x10xbf16, #tpu.memory_space<vmem>>, vector<32x10xbf16>
    %cst_8 = arith.constant dense<0.000000e+00> : vector<8x10xf32>
    %11 = tpu.matmul %9, %10, %cst_8 {dimension_numbers = #tpu.dot_dimension_numbers<[1], [0], [0], [1], [0, 0, 1, 1], [], []>} : vector<8x32xbf16>, vector<32x10xbf16>, vector<8x10xf32> -> vector<8x10xf32>
    %c0_9 = arith.constant 0 : index
    %c0_10 = arith.constant 0 : index
    %12 = vector.load %arg5[%c0_9, %c0_10] : memref<1x10xf32, #tpu.memory_space<vmem>>, vector<1x10xf32>
    %13 = vector.broadcast %12 : vector<1x10xf32> to vector<8x10xf32>
    %14 = arith.addf %11, %13 : vector<8x10xf32>
    %c0_11 = arith.constant 0 : index
    %c0_12 = arith.constant 0 : index
    %15 = vector.load %arg6[%c0_11, %c0_12] : memref<8x10xf32, #tpu.memory_space<vmem>>, vector<8x10xf32>
    tpu.vector_store %arg6[%c0_11, %c0_12], %14 {strides = array<i32>} : memref<8x10xf32, #tpu.memory_space<vmem>>, vector<8x10xf32>,
    return
  }
  func.func @transform_0(%arg0: i32) -> (i32, i32) {
    %c0_i32 = arith.constant 0 : i32
    %c0_i32_0 = arith.constant 0 : i32
    return %arg0, %c0_i32 : i32, i32
  }
  func.func @transform_1(%arg0: i32) -> (i32, i32) {
    %c0_i32 = arith.constant 0 : i32
    %c0_i32_0 = arith.constant 0 : i32
    %c0_i32_1 = arith.constant 0 : i32
    return %c0_i32, %c0_i32_0 : i32, i32
  }
  func.func @transform_2(%arg0: i32) -> (i32, i32) {
    %c0_i32 = arith.constant 0 : i32
    %c0_i32_0 = arith.constant 0 : i32
    %c0_i32_1 = arith.constant 0 : i32
    return %c0_i32, %c0_i32_0 : i32, i32
  }
  func.func @transform_3(%arg0: i32) -> (i32, i32) {
    %c0_i32 = arith.constant 0 : i32
    %c0_i32_0 = arith.constant 0 : i32
    %c0_i32_1 = arith.constant 0 : i32
    return %c0_i32, %c0_i32_0 : i32, i32
  }
  func.func @transform_4(%arg0: i32) -> (i32, i32) {
    %c0_i32 = arith.constant 0 : i32
    %c0_i32_0 = arith.constant 0 : i32
    %c0_i32_1 = arith.constant 0 : i32
    return %c0_i32, %c0_i32_0 : i32, i32
  }
  func.func @transform_5(%arg0: i32) -> (i32, i32) {
    %c0_i32 = arith.constant 0 : i32
    %c0_i32_0 = arith.constant 0 : i32
    return %arg0, %c0_i32 : i32, i32
  }
}

</mosaic_0001>

<bundles_post_ra>
// kernel: mlp_forward.1
= control target key start
LH: loop header
LB: loop body
LE: loop exit
PB: predicated region body
PF: predicated region fallthrough
CT: control target
= control target key end

     0   :  { %v902_v44 = vmov 0.0   ;;  %vm903_vm0 = vmmov 0   ;;  %vm435_vm1 = vcmask 130048   ;;  %s1129_s0 = inlined_call_operand.vmem [shape: f32[8,784], index: 0, kind: input, shape index: {}]   ;;  %s1130_s1 = inlined_call_operand.vmem [shape: bf16[784,32], index: 1, kind: input, shape index: {}]   ;;  %s1131_s2 = inlined_call_operand.vmem [shape: f32[1,32], index: 2, kind: input, shape index: {}]   ;;  %s1132_s3 = inlined_call_operand.vmem [shape: bf16[32,10], index: 3, kind: input, shape index: {}]   ;;  %s1133_s4 = inlined_call_operand.vmem [shape: f32[1,10], index: 4, kind: input, shape index: {}]   ;;  %s1134_s5 = inlined_call_operand.hbm [shape: f32[8,10], index: 5, kind: output, shape index: {}]  }
   0x1   :  { %v827_v0 = vld [vmem:[%s1130_s1 + $0x40] sm:$0xff]   ;;  %v831_v4 = vld [vmem:[%s1130_s1 + $0x48] sm:$0xff]   ;;  %v835_v8 = vld [vmem:[%s1130_s1 + $0x50] sm:$0xff]  }
   0x2   :  { %v828_v1 = vld [vmem:[%s1130_s1] sm:$0xff]   ;;  %739 = vmatprep.subr.bf16.mxu0 %v827_v0  ;;  %v832_v5 = vld [vmem:[%s1130_s1 + $0x8] sm:$0xff]   ;;  %v836_v9 = vld [vmem:[%s1130_s1 + $0x10] sm:$0xff]  }
   0x3   :  { %v829_v2 = vld [vmem:[%s1130_s1 + $0xc0] sm:$0xff]   ;;  %740 = vmatpush3.bf16.msra.mxu0 %v828_v1  ;;  %v833_v6 = vld [vmem:[%s1130_s1 + $0xc8] sm:$0xff]   ;;  %v837_v10 = vld [vmem:[%s1130_s1 + $0xd0] sm:$0xff]  }
   0x4   :  { %v830_v3 = vld [vmem:[%s1130_s1 + $0x80] sm:$0xff]   ;;  %761 = vmatprep.subr.bf16.mxu1 %v829_v2  ;;  %741 = vmatprep.subr.bf16.mxu0 %v831_v4  ;;  %v834_v7 = vld [vmem:[%s1130_s1 + $0x88] sm:$0xff]   ;;  %v838_v11 = vld [vmem:[%s1130_s1 + $0x90] sm:$0xff]  }
   0x5   :  { %762 = vmatpush3.bf16.msra.mxu1 %v830_v3  ;;  %v839_v12 = vld [vmem:[%s1130_s1 + $0x58] sm:$0xff]   ;;  %v843_v16 = vld [vmem:[%s1130_s1 + $0x60] sm:$0xff]   ;;  %v847_v20 = vld [vmem:[%s1130_s1 + $0x68] sm:$0xff]  }
   0x6   :  { %763 = vmatprep.subr.bf16.mxu1 %v833_v6  ;;  %v840_v13 = vld [vmem:[%s1130_s1 + $0x18] sm:$0xff]   ;;  %v844_v17 = vld [vmem:[%s1130_s1 + $0x20] sm:$0xff]   ;;  %v848_v21 = vld [vmem:[%s1130_s1 + $0x28] sm:$0xff]  }
   0x7   :  { %742 = vmatpush3.bf16.msra.mxu0 %v832_v5  ;;  %v841_v14 = vld [vmem:[%s1130_s1 + $0xd8] sm:$0xff]   ;;  %v845_v18 = vld [vmem:[%s1130_s1 + $0xe0] sm:$0xff]   ;;  %v849_v22 = vld [vmem:[%s1130_s1 + $0xe8] sm:$0xff]  }
   0x8   :  { %743 = vmatprep.subr.bf16.mxu0 %v835_v8  ;;  %v842_v15 = vld [vmem:[%s1130_s1 + $0x98] sm:$0xff]   ;;  %v846_v19 = vld [vmem:[%s1130_s1 + $0xa0] sm:$0xff]   ;;  %v850_v23 = vld [vmem:[%s1130_s1 + $0xa8] sm:$0xff]  }
   0x9   :  { %764 = vmatpush3.bf16.msra.mxu1 %v834_v7  ;;  %v851_v24 = vld [vmem:[%s1130_s1 + $0x70] sm:$0xff]   ;;  %v855_v28 = vld [vmem:[%s1130_s1 + $0x78] sm:$0xff]   ;;  %v23_v31 = vld [vmem:[%s1129_s0 + $0x8] sm:$0xff] }
   0xa   :  { %765 = vmatprep.subr.bf16.mxu1 %v837_v10  ;;  %v852_v25 = vld [vmem:[%s1130_s1 + $0x30] sm:$0xff]   ;;  %v856_v29 = vld [vmem:[%s1130_s1 + $0x38] sm:$0xff]   ;;  %v30_v32 = vpack.c.bf16 %v23_v31, %v23_v31  ;;  %v22_v34 = vld [vmem:[%s1129_s0] sm:$0xff] }
   0xb   :  { %744 = vmatpush3.bf16.msra.mxu0 %v836_v9  ;;  %v853_v26 = vld [vmem:[%s1130_s1 + $0xf0] sm:$0xff]   ;;  %v857_v30 = vld [vmem:[%s1130_s1 + $0xf8] sm:$0xff]   ;;  %v29_v35 = vpack.c.bf16 %v22_v34, %v22_v34  ;;  %v859_v36 = vld [vmem:[%s1130_s1 + $0x140] sm:$0xff]  }
   0xc   :  { %745 = vmatprep.subr.bf16.mxu0 %v839_v12  ;;  %v854_v27 = vld [vmem:[%s1130_s1 + $0xb0] sm:$0xff]   ;;  %v858_v33 = vld [vmem:[%s1130_s1 + $0xb8] sm:$0xff]   ;;  %471 = vmatprep.mubr.bf16.mxu0 %v30_v32  ;;  %v860_v39 = vld [vmem:[%s1130_s1 + $0x100] sm:$0xff]  }
   0xd   :  { %766 = vmatpush3.bf16.msra.mxu1 %v838_v11  ;;  %v25_v37 = vld [vmem:[%s1129_s0 + $0x18] sm:$0xff]  ;;  %v24_v40 = vld [vmem:[%s1129_s0 + $0x10] sm:$0xff]  ;;  %v861_v42 = vld [vmem:[%s1130_s1 + $0x148] sm:$0xff]  }
   0xe   :  { %767 = vmatprep.subr.bf16.mxu1 %v841_v14  ;;  %v32_v38 = vpack.c.bf16 %v25_v37, %v25_v37  ;;  %v31_v41 = vpack.c.bf16 %v24_v40, %v24_v40  ;;  %v862_v43 = vld [vmem:[%s1130_s1 + $0x108] sm:$0xff]   ;;  %v863_v45 = vld [vmem:[%s1130_s1 + $0x150] sm:$0xff]   ;;  %v865_v47 = vld [vmem:[%s1130_s1 + $0x158] sm:$0xff]  }
   0xf   :  { %746 = vmatpush3.bf16.msra.mxu0 %v840_v13  ;;  %v864_v46 = vld [vmem:[%s1130_s1 + $0x110] sm:$0xff]   ;;  %v866_v48 = vld [vmem:[%s1130_s1 + $0x118] sm:$0xff]   ;;  %v867_v49 = vld [vmem:[%s1130_s1 + $0x160] sm:$0xff]  }
  0x10   :  { %747 = vmatprep.subr.bf16.mxu0 %v843_v16  ;;  %511 = vmatprep.mubr.bf16.mxu1 %v32_v38  ;;  %v868_v50 = vld [vmem:[%s1130_s1 + $0x120] sm:$0xff]   ;;  %v869_v51 = vld [vmem:[%s1130_s1 + $0x168] sm:$0xff]   ;;  %v28_v56 = vld [vmem:[%s1129_s0 + $0x30] sm:$0xff] }
  0x11   :  { %768 = vmatpush3.bf16.msra.mxu1 %v842_v15  ;;  %v870_v52 = vld [vmem:[%s1130_s1 + $0x128] sm:$0xff]   ;;  %v875_v53 = vld [vmem:[%s1130_s1 + $0x180] sm:$0xff]   ;;  %v35_v57 = vpack.c.bf16 %v28_v56, %v28_v56 }
  0x12   :  { %769 = vmatprep.subr.bf16.mxu1 %v845_v18  ;;  %v27_v54 = vld [vmem:[%s1129_s0 + $0x28] sm:$0xff] }
  0x13   :  { %748 = vmatpush3.bf16.msra.mxu0 %v844_v17  ;;  %v34_v55 = vpack.c.bf16 %v27_v54, %v27_v54 }
  0x14   :  { %749 = vmatprep.subr.bf16.mxu0 %v847_v20 }
  0x15   :  { %770 = vmatpush3.bf16.msra.mxu1 %v846_v19 }
  0x16   :  { %771 = vmatprep.subr.bf16.mxu1 %v849_v22 }
  0x17   :  { %750 = vmatpush3.bf16.msra.mxu0 %v848_v21 }
  0x18   :  { %751 = vmatprep.subr.bf16.mxu0 %v851_v24 }
  0x19   :  { %772 = vmatpush3.bf16.msra.mxu1 %v850_v23 }
  0x1a   :  { %773 = vmatprep.subr.bf16.mxu1 %v853_v26 }
  0x1b   :  { %752 = vmatpush3.bf16.msra.mxu0 %v852_v25 }
  0x1c   :  { %753 = vmatprep.subr.bf16.mxu0 %v855_v28 }
  0x1d   :  { %774 = vmatpush3.bf16.msra.mxu1 %v854_v27 }
  0x1e   :  { %775 = vmatprep.subr.bf16.mxu1 %v857_v30 }
  0x1f   :  { %754 = vmatpush3.bf16.msra.mxu0 %v856_v29 }
  0x20   :  { %783 = vmatprep.subr.bf16.mxu0 %v859_v36 }
  0x21   :  { %776 = vmatpush3.bf16.msra.mxu1 %v858_v33 }
  0x22   :  { %472 = vmatmul.mubr.bf16.vlgmr.msra.gmra.mrb[0].mxu0 %v29_v35  ;;  %810 = vmatprep.subr.bf16.mxu1 %v902_v44 }
  0x23   :  { %784 = vmatpush3.bf16.msra.mxu0 %v860_v39 }
  0x24   :  { %512 = vmatmul.mubr.bf16.vlgmr.msra.gmra.mrb[0].mxu1 %v31_v41  ;;  %785 = vmatprep.subr.bf16.mxu0 %v861_v42 }
  0x25   :  { %812 = vmatprep.mubr.msk.bf16.mxu1 %vm903_vm0, %v902_v44  ;;  %811 = vmatpush3.bf16.msra.mxu1 %v875_v53 }
  0x27   :  { %786 = vmatpush3.bf16.msra.mxu0 %v862_v43 }
  0x28   :  { %787 = vmatprep.subr.bf16.mxu0 %v863_v45 }
  0x2b   :  { %788 = vmatpush3.bf16.msra.mxu0 %v864_v46 }
  0x2c   :  { %789 = vmatprep.subr.bf16.mxu0 %v865_v47 }
  0x2f   :  { %790 = vmatpush3.bf16.msra.mxu0 %v866_v48 }
  0x30   :  { %791 = vmatprep.subr.bf16.mxu0 %v867_v49 }
  0x33   :  { %792 = vmatpush3.bf16.msra.mxu0 %v868_v50 }
  0x34   :  { %10 = vsyncpa [#allocation3], 0  ;;  %793 = vmatprep.subr.bf16.mxu0 %v869_v51  ;;  %v871_v58 = vld [vmem:[%s1130_s1 + $0x170] sm:$0xff]   ;;  %551 = vmatprep.mubr.bf16.mxu0 %v34_v55  ;;  %v873_v60 = vld [vmem:[%s1130_s1 + $0x178] sm:$0xff]   ;;  %vm624_vm2 = vcmask 261120   ;;  %vm668_vm3 = vcmask 80896  }
  0x35   :  { %816 = vmatprep.subr.bf16.mxu1 %v902_v44  ;;  %813 = vmatmul.mubr.msk.bf16.vlgmr.msra.gmra.mrb[4].mxu1 %vm435_vm1, %v35_v57  ;;  %v872_v59 = vld [vmem:[%s1130_s1 + $0x130] sm:$0xff]   ;;  %v874_v61 = vld [vmem:[%s1130_s1 + $0x138] sm:$0xff]   ;;  %v26_v62 = vld [vmem:[%s1129_s0 + $0x20] sm:$0xff] }
  0x36   :  { %820 = vmatprep.mubr.msk.bf16.mxu1 %vm903_vm0, %v902_v44  ;;  %v33_v63 = vpack.c.bf16 %v26_v62, %v26_v62  ;;  %v876_v0 = vld [vmem:[%s1132_s3] sm:$0xff]   ;;  %v877_v1 = vld [vmem:[%s1132_s3 + $0x8] sm:$0xff]   ;;  %s904_s3 = smov [#allocation2]  }
  0x37   :  { %794 = vmatpush3.bf16.msra.mxu0 %v870_v52  ;;  %817 = vmatpush3.bf16.msra.mxu1 %v876_v0  ;;  %v684_v3 = vld [vmem:[%s1131_s2] ss:$0 sm:$0xff]  ;;  %s676_s10 = sshll.u32 %s904_s3, 4  ;;  %s677_s10 = int_to_ptr.vmem [resolvable:$true] %s676_s10 }
  0x38   :  { %795 = vmatprep.subr.bf16.mxu0 %v871_v58  ;;  %818 = vmatprep.subr.bf16.mxu1 %v902_v44  ;;  %v735_v28 = vld [vmem:[%s1133_s4] ss:$0 sm:$0xff]  ;;  %s878_s11 = scalar_lea.vmem %s677_s10, 128  ;;  %p883_p1 = scmp.lt.s32.totalorder %s677_s10, %s677_s10 }
  0x39   :  { %p879_p0 = scmp.ne.s32.totalorder %s677_s10, %s878_s11  ;;  %p884_p2 = scmp.lt.s32.totalorder %s878_s11, %s878_s11 }
  0x3b   :  { %796 = vmatpush3.bf16.msra.mxu0 %v872_v59  ;;  %819 = vmatpush3.bf16.msra.mxu1 %v877_v1  ;;  %p885_p3 = por %p884_p2, %p883_p1 }
  0x3c   :  { %797 = vmatprep.subr.bf16.mxu0 %v873_v60 }
  0x3d   :  { %p886_p4 = pnand %p885_p3, %p879_p0 }
  0x3f   :  { %798 = vmatpush3.bf16.msra.mxu0 %v874_v61 }
  0x42   :  { %552 = vmatmul.mubr.bf16.vlgmr.msra.gmra.mrb[4].mxu0 %v33_v63 }
  0xf5   :  { %v755_v2 = vpop.f32.mrb[0].mxu0 }
  0xf6   :  { %v756_v4 = vpop.f32.mrb[1].mxu0 }
  0xf7   :  { %v757_v5 = vadd.f32 %v756_v4, %v755_v2  ;;  %v758_v6 = vpop.f32.mrb[2].mxu0  ;;  %v777_v7 = vpop.f32.mrb[0].mxu1 }
  0xf8   :  { %v759_v8 = vpop.f32.mrb[3].mxu0  ;;  %v778_v10 = vpop.f32.mrb[1].mxu1 }
  0xf9   :  { %v474_v9 = vadd.f32 %v757_v5, %v684_v3  ;;  %v779_v11 = vadd.f32 %v778_v10, %v777_v7  ;;  %v780_v12 = vpop.f32.mrb[2].mxu1 }
  0xfa   :  { %v781_v13 = vpop.f32.mrb[3].mxu1 }
  0xfb   :  { %v514_v14 = vadd.f32 %v779_v11, %v474_v9 }
 0x108   :  { %v593_v15 = vpop.f32.mrb[4].mxu1 }
 0x109   :  { %v814_v16 = vpop.f32.mrb[5].mxu1 }
 0x10a   :  { %v596_v17 = vpop.f32.mrb[6].mxu1 }
 0x10b   :  { %v815_v18 = vpop.f32.mrb[7].mxu1 }
 0x115   :  { %v799_v19 = vpop.f32.mrb[4].mxu0 }
 0x116   :  { %v800_v20 = vpop.f32.mrb[5].mxu0 }
 0x117   :  { %v801_v21 = vadd.f32 %v800_v20, %v799_v19  ;;  %v802_v22 = vpop.f32.mrb[6].mxu0 }
 0x118   :  { %v803_v23 = vpop.f32.mrb[7].mxu0 }
 0x119   :  { %v554_v24 = vadd.f32 %v801_v21, %v514_v14 }
 0x11b   :  { %v594_v25 = vadd.f32 %v593_v15, %v554_v24 }
 0x11d   :  { %v599_v26 = vmax.f32 %v594_v25, 0.0 }
 0x11f   :  { %v600_v27 = vpack.c.bf16 %v599_v26, %v599_v26 }
 0x121   :  { %821 = vmatmul.mubr.msk.bf16.vlgmr.msra.gmra.mrb[8].mxu1 %vm624_vm2, %v600_v27 }
 0x1f4   :  { %v662_v29 = vpop.f32.mrb[8].mxu1 }
 0x1f5   :  { %v663_v30 = vadd.f32 %v735_v28, %v662_v29  ;;  %v822_v31 = vpop.f32.mrb[9].mxu1 }
 0x1f6   :  { %v665_v32 = vpop.f32.mrb[10].mxu1 }
 0x1f7   :  { %v823_v33 = vpop.f32.mrb[11].mxu1  ;;  %669 = vst.msk [vmem:[#allocation2] sm:$0xff] %vm668_vm3, %v663_v30 }
 0x1f8   :  { %889 = shalt.err (!%p886_p4)
}
 0x1f9   :  { %s890_s4 = scalar_lea.hbm %s1134_s5, 128 }
 0x1fa   :  { %p891_p5 = scmp.ne.s32.totalorder %s1134_s5, %s890_s4  ;;  %p894_p6 = scmp.lt.u32.totalorder %s890_s4, %s1134_s5 }
 0x1fc   :  { %p896_p7 = pnand %p894_p6, %p891_p5 }
 0x1fe   :  { %899 = shalt.err (!%p896_p7)
}
 0x1ff   :  { %679 = dma.vmem_to_hbm [thread:$0]  %s677_s10, 128, %s1134_s5, [#allocation3]  }
 0x200   :  { %900 = dma.done.wait [#allocation3], 128  }
 0x201   :  { %901 = vsyncadd [#allocation3], 4294967168 }
 0x202   :  { %683 = vsyncpa [#allocation3], 1 }

</bundles_post_ra>
